<compile_context>
chip_gen: v5e
topology: v5e:2x2
jax: 0.10.0
libtpu: 0.0.40
codegen_flags: <defaults>
</compile_context>

<pallas_src>
import functools

import jax
import jax.numpy as jnp
from jax.experimental import pallas as pl
from jax.experimental.pallas import tpu as pltpu

_SUBLANE = 8
_LANE = 128

_ACTIVATIONS = {
    "none": lambda h: h,
    "relu": lambda h: jnp.maximum(h, 0.0),
    "elu": lambda h: jnp.where(h > 0, h, jnp.expm1(h)),
    "leakyrelu": lambda h: jnp.where(h > 0, h, 0.01 * h),
    "sigmoid": jax.nn.sigmoid,
    "tanh": jnp.tanh,
}


def _round_up(x: int, m: int) -> int:
    return ((x + m - 1) // m) * m


def _pad_dim(d: int) -> int:
    # 128-lane alignment; 256 for very wide (compute-bound) layers so the
    # 2x256x256 MXU on v6e/v7x stays full.
    align = 256 if d >= 1024 else _LANE
    return _round_up(d, align)


def _vmem_capacity_bytes() -> int:
    try:
        return int(pltpu.get_tpu_info().vmem_capacity_bytes)
    except Exception:
        return 64 * 1024 * 1024  # conservative default (v7x per-TensorCore)


def _mlp_kernel(*refs, n_layers: int, activation: str, compute_dtype):
    # refs = (x_ref, w0_ref, b0_ref, w1_ref, b1_ref, ..., o_ref)
    x_ref = refs[0]
    o_ref = refs[-1]
    wb = refs[1:-1]
    act = _ACTIVATIONS[activation]

    h = x_ref[...].astype(jnp.float32)
    for i in range(n_layers):
        w = wb[2 * i][...]                       # (Din_i_pad, Dout_i_pad), VMEM-resident
        b = wb[2 * i + 1][...].astype(jnp.float32)   # (1, Dout_i_pad)
        h = jnp.dot(h.astype(compute_dtype), w,
                    preferred_element_type=jnp.float32) + b
        if i < n_layers - 1:                     # activation on all but last layer
            h = act(h)
    o_ref[...] = h.astype(o_ref.dtype)


def mlp_pallas(x, params, *, batch_tile: int = 1024, activation: str = "relu",
               param_dtype=None):
    """Fused  y = Linear_n(act(... act(Linear_0(x)) ...))  in one pallas_call.

    x:      (B, Din) float32
    params: list of (w_t, b) with w_t = weight.T of shape (in, out), b (out,)
    param_dtype: optional jnp.bfloat16 for bf16-native MXU on wide layers.
    """
    B, Din = x.shape
    n_layers = len(params)

    dims = [Din] + [w.shape[1] for (w, _) in params]
    for i, (w, _) in enumerate(params):
        assert w.shape[0] == dims[i], "params must be (in,out)-transposed weights"
    dims_pad = [_pad_dim(d) for d in dims]
    Din_pad, Dout, Dout_pad = dims_pad[0], dims[-1], dims_pad[-1]

    compute_dtype = param_dtype if param_dtype is not None else jnp.float32

    # --- zero-pad params to lane-aligned shapes (exact), optional bf16 weights
    padded = []
    for i, (w_t, b) in enumerate(params):
        din, dout = w_t.shape
        dinp, doutp = dims_pad[i], dims_pad[i + 1]
        w_p = jnp.pad(w_t, ((0, dinp - din), (0, doutp - dout)))
        if param_dtype is not None:
            w_p = w_p.astype(param_dtype)
        b_p = jnp.pad(b, (0, doutp - dout)).reshape(1, doutp)  # bias stays f32
        padded.append((w_p, b_p))
    param_bytes = sum(int(w.size) * w.dtype.itemsize + int(b.size) * b.dtype.itemsize
                      for (w, b) in padded)

    # --- per-generation VMEM budget (leave headroom for Mosaic internal scratch)
    budget = int(0.78 * _vmem_capacity_bytes())

    # --- batch tile: >=2 tiles when B > 8 (both v7x TCs), shrink to fit budget
    itemsize = jnp.dtype(x.dtype).itemsize
    max_feat = max(dims_pad)

    def _est(tm_):
        e = 2 * itemsize * tm_ * Din_pad      # double-buffered input tiles
        e += 2 * itemsize * tm_ * Dout_pad    # double-buffered output tiles
        e += 2 * 4 * tm_ * max_feat           # ~2 live f32 intermediate activations
        e += param_bytes                      # single-buffered resident params
        e += 2 * (1 << 20)                    # compiler internal-scratch headroom
        return e

    if B <= _SUBLANE:
        tm = B
    else:
        tm = min(batch_tile, max(_SUBLANE, _round_up((B + 1) // 2, _SUBLANE)))
        while tm > _SUBLANE and _est(tm) > budget:
            tm = max(_SUBLANE, _round_up(tm // 2, _SUBLANE))
    if param_bytes > budget:
        # TODO(synk): stream weight tiles from HBM (memory_space=pl.ANY +
        # pltpu.emit_pipeline) when the full parameter set cannot be VMEM-resident
        # (very large MLPs on v7x's 64 MiB VMEM).
        pass

    Bp = B if B <= _SUBLANE else _round_up(B, tm)

    # --- pad activations: batch rows to Bp, input columns to Din_pad (zeros)
    x_p = x
    if Bp != B or Din_pad != Din:
        x_p = jnp.pad(x, ((0, Bp - B), (0, Din_pad - Din)))

    grid = (Bp // tm,)
    x_spec = pl.BlockSpec((tm, Din_pad), lambda i: (i, 0))
    out_spec = pl.BlockSpec((tm, Dout_pad), lambda i: (i, 0))

    flat_inputs = [x_p]
    for (w_p, b_p) in padded:
        flat_inputs.append(w_p)
        flat_inputs.append(b_p)

    flops = 2 * Bp * sum(dims_pad[i] * dims_pad[i + 1] for i in range(n_layers))
    bytes_accessed = (int(x_p.size) * itemsize + Bp * Dout_pad * itemsize + param_bytes)
    cost = pl.CostEstimate(flops=int(flops), transcendentals=0,
                           bytes_accessed=int(bytes_accessed))

    kernel = functools.partial(_mlp_kernel, n_layers=n_layers,
                               activation=activation, compute_dtype=compute_dtype)

    def _build(single_buffer_params: bool):
        const_kwargs = ({"pipeline_mode": pl.Buffered(1)}
                        if single_buffer_params else {})
        in_specs = [x_spec]
        for (w_p, b_p) in padded:
            dinp, doutp = w_p.shape
            in_specs.append(pl.BlockSpec((dinp, doutp), lambda i: (0, 0), **const_kwargs))
            in_specs.append(pl.BlockSpec((1, doutp), lambda i: (0, 0), **const_kwargs))
        return pl.pallas_call(
            kernel,
            out_shape=jax.ShapeDtypeStruct((Bp, Dout_pad), x.dtype),
            grid=grid,
            in_specs=in_specs,
            out_specs=out_spec,
            compiler_params=pltpu.CompilerParams(
                dimension_semantics=("parallel",),   # batch tiles independent
                vmem_limit_bytes=int(budget),
            ),
            cost_estimate=cost,
        )

    try:
        out = _build(True)(*flat_inputs)
    except Exception:
        # Fallback for toolchains that reject pipeline_mode=pl.Buffered(1) on
        # constant-index blocks; semantics identical, params double-buffered.
        out = _build(False)(*flat_inputs)

    return out[:B, :Dout]   # slice away batch / lane padding


def init_mlp_params(key, dimensions):
    """PyTorch-style nn.Linear init; returns list of (w_t, b), w_t = weight.T."""
    params = []
    for i in range(len(dimensions) - 1):
        din, dout = dimensions[i], dimensions[i + 1]
        key, kw, kb = jax.random.split(key, 3)
        bound = 1.0 / jnp.sqrt(din)
        w = jax.random.uniform(kw, (dout, din), jnp.float32, -bound, bound)
        b = jax.random.uniform(kb, (dout,), jnp.float32, -bound, bound)
        params.append((w.T, b))
    return params


def mlp_reference(x, params, activation: str = "relu"):
    act = _ACTIVATIONS[activation]
    n = len(params)
    for i, (w_t, b) in enumerate(params):
        x = x @ w_t + b
        if i < n - 1:
            x = act(x)
    return x


if __name__ == "__main__":
    key = jax.random.PRNGKey(0)

    # Case 1: dimensions=[16,32,32,8] -> Linear(16,32),ReLU,Linear(32,32),ReLU,Linear(32,8)
    dims1 = [16, 32, 32, 8]
    batch1 = 8
    key, kx1 = jax.random.split(key)
    x1 = jax.random.normal(kx1, (batch1, dims1[0]), jnp.float32)
    params1 = init_mlp_params(key, dims1)
    out1 = jax.block_until_ready(mlp_pallas(x1, params1))
    ref1 = mlp_reference(x1, params1)
    assert out1.shape == (batch1, dims1[-1])
    assert jnp.allclose(out1, ref1, atol=1e-4, rtol=1e-4), "case1 mismatch vs reference"

    # Case 2: non-aligned batch (exercises >=2 batch tiles + row/col padding)
    dims2 = [16, 64, 32]
    batch2 = 300
    key, kx2 = jax.random.split(key)
    x2 = jax.random.normal(kx2, (batch2, dims2[0]), jnp.float32)
    params2 = init_mlp_params(key, dims2)
    out2 = jax.block_until_ready(mlp_pallas(x2, params2))
    ref2 = mlp_reference(x2, params2)
    assert out2.shape == (batch2, dims2[-1])
    assert jnp.allclose(out2, ref2, atol=1e-4, rtol=1e-4), "case2 mismatch vs reference"

    print("KERNEL_OK")
</pallas_src>

<mosaic_0001>
module attributes {stable_mosaic.version = 11 : i64} {
  func.func @_mlp_kernel(%arg0: i32, %arg1: memref<8x128xf32, #tpu.memory_space<vmem>>, %arg2: memref<128x128xf32, #tpu.memory_space<vmem>>, %arg3: memref<1x128xf32, #tpu.memory_space<vmem>>, %arg4: memref<128x128xf32, #tpu.memory_space<vmem>>, %arg5: memref<1x128xf32, #tpu.memory_space<vmem>>, %arg6: memref<128x128xf32, #tpu.memory_space<vmem>>, %arg7: memref<1x128xf32, #tpu.memory_space<vmem>>, %arg8: memref<8x128xf32, #tpu.memory_space<vmem>>) attributes {dimension_semantics = [#tpu.dimension_semantics<parallel>], iteration_bounds = array<i64: 1>, scalar_prefetch = 0 : i64, scratch_operands = 0 : i64, tpu.core_type = #tpu.core_type<tc>, window_params = [{transform_indices = @transform_0, window_bounds = array<i64: 8, 128>}, {pipeline_mode = #tpu.pipeline_mode<synchronous>, transform_indices = @transform_1, window_bounds = array<i64: 128, 128>}, {pipeline_mode = #tpu.pipeline_mode<synchronous>, transform_indices = @transform_2, window_bounds = array<i64: 1, 128>}, {pipeline_mode = #tpu.pipeline_mode<synchronous>, transform_indices = @transform_3, window_bounds = array<i64: 128, 128>}, {pipeline_mode = #tpu.pipeline_mode<synchronous>, transform_indices = @transform_4, window_bounds = array<i64: 1, 128>}, {pipeline_mode = #tpu.pipeline_mode<synchronous>, transform_indices = @transform_5, window_bounds = array<i64: 128, 128>}, {pipeline_mode = #tpu.pipeline_mode<synchronous>, transform_indices = @transform_6, window_bounds = array<i64: 1, 128>}, {transform_indices = @transform_7, window_bounds = array<i64: 8, 128>}]} {
    %c0 = arith.constant 0 : index
    %c0_0 = arith.constant 0 : index
    %0 = vector.load %arg1[%c0, %c0_0] : memref<8x128xf32, #tpu.memory_space<vmem>>, vector<8x128xf32>
    %c0_1 = arith.constant 0 : index
    %c0_2 = arith.constant 0 : index
    %1 = vector.load %arg2[%c0_1, %c0_2] : memref<128x128xf32, #tpu.memory_space<vmem>>, vector<128x128xf32>
    %c0_3 = arith.constant 0 : index
    %c0_4 = arith.constant 0 : index
    %2 = vector.load %arg3[%c0_3, %c0_4] : memref<1x128xf32, #tpu.memory_space<vmem>>, vector<1x128xf32>
    %cst = arith.constant dense<0.000000e+00> : vector<8x128xf32>
    %3 = tpu.matmul %0, %1, %cst {dimension_numbers = #tpu.dot_dimension_numbers<[1], [0], [0], [1], [0, 0, 1, 1], [], []>} : vector<8x128xf32>, vector<128x128xf32>, vector<8x128xf32> -> vector<8x128xf32>
    %4 = vector.broadcast %2 : vector<1x128xf32> to vector<8x128xf32>
    %5 = arith.addf %3, %4 : vector<8x128xf32>
    %cst_5 = arith.constant 0.000000e+00 : f32
    %6 = vector.broadcast %cst_5 : f32 to vector<8x128xf32>
    %7 = arith.maximumf %5, %6 : vector<8x128xf32>
    %c0_6 = arith.constant 0 : index
    %c0_7 = arith.constant 0 : index
    %8 = vector.load %arg4[%c0_6, %c0_7] : memref<128x128xf32, #tpu.memory_space<vmem>>, vector<128x128xf32>
    %c0_8 = arith.constant 0 : index
    %c0_9 = arith.constant 0 : index
    %9 = vector.load %arg5[%c0_8, %c0_9] : memref<1x128xf32, #tpu.memory_space<vmem>>, vector<1x128xf32>
    %cst_10 = arith.constant dense<0.000000e+00> : vector<8x128xf32>
    %10 = tpu.matmul %7, %8, %cst_10 {dimension_numbers = #tpu.dot_dimension_numbers<[1], [0], [0], [1], [0, 0, 1, 1], [], []>} : vector<8x128xf32>, vector<128x128xf32>, vector<8x128xf32> -> vector<8x128xf32>
    %11 = vector.broadcast %9 : vector<1x128xf32> to vector<8x128xf32>
    %12 = arith.addf %10, %11 : vector<8x128xf32>
    %cst_11 = arith.constant 0.000000e+00 : f32
    %13 = vector.broadcast %cst_11 : f32 to vector<8x128xf32>
    %14 = arith.maximumf %12, %13 : vector<8x128xf32>
    %c0_12 = arith.constant 0 : index
    %c0_13 = arith.constant 0 : index
    %15 = vector.load %arg6[%c0_12, %c0_13] : memref<128x128xf32, #tpu.memory_space<vmem>>, vector<128x128xf32>
    %c0_14 = arith.constant 0 : index
    %c0_15 = arith.constant 0 : index
    %16 = vector.load %arg7[%c0_14, %c0_15] : memref<1x128xf32, #tpu.memory_space<vmem>>, vector<1x128xf32>
    %cst_16 = arith.constant dense<0.000000e+00> : vector<8x128xf32>
    %17 = tpu.matmul %14, %15, %cst_16 {dimension_numbers = #tpu.dot_dimension_numbers<[1], [0], [0], [1], [0, 0, 1, 1], [], []>} : vector<8x128xf32>, vector<128x128xf32>, vector<8x128xf32> -> vector<8x128xf32>
    %18 = vector.broadcast %16 : vector<1x128xf32> to vector<8x128xf32>
    %19 = arith.addf %17, %18 : vector<8x128xf32>
    %c0_17 = arith.constant 0 : index
    %c0_18 = arith.constant 0 : index
    %20 = vector.load %arg8[%c0_17, %c0_18] : memref<8x128xf32, #tpu.memory_space<vmem>>, vector<8x128xf32>
    tpu.vector_store %arg8[%c0_17, %c0_18], %19 {strides = array<i32>} : memref<8x128xf32, #tpu.memory_space<vmem>>, vector<8x128xf32>,
    return
  }
  func.func @transform_0(%arg0: i32) -> (i32, i32) {
    %c0_i32 = arith.constant 0 : i32
    %c0_i32_0 = arith.constant 0 : i32
    return %arg0, %c0_i32 : i32, i32
  }
  func.func @transform_1(%arg0: i32) -> (i32, i32) {
    %c0_i32 = arith.constant 0 : i32
    %c0_i32_0 = arith.constant 0 : i32
    %c0_i32_1 = arith.constant 0 : i32
    return %c0_i32, %c0_i32_0 : i32, i32
  }
  func.func @transform_2(%arg0: i32) -> (i32, i32) {
    %c0_i32 = arith.constant 0 : i32
    %c0_i32_0 = arith.constant 0 : i32
    %c0_i32_1 = arith.constant 0 : i32
    return %c0_i32, %c0_i32_0 : i32, i32
  }
  func.func @transform_3(%arg0: i32) -> (i32, i32) {
    %c0_i32 = arith.constant 0 : i32
    %c0_i32_0 = arith.constant 0 : i32
    %c0_i32_1 = arith.constant 0 : i32
    return %c0_i32, %c0_i32_0 : i32, i32
  }
  func.func @transform_4(%arg0: i32) -> (i32, i32) {
    %c0_i32 = arith.constant 0 : i32
    %c0_i32_0 = arith.constant 0 : i32
    %c0_i32_1 = arith.constant 0 : i32
    return %c0_i32, %c0_i32_0 : i32, i32
  }
  func.func @transform_5(%arg0: i32) -> (i32, i32) {
    %c0_i32 = arith.constant 0 : i32
    %c0_i32_0 = arith.constant 0 : i32
    %c0_i32_1 = arith.constant 0 : i32
    return %c0_i32, %c0_i32_0 : i32, i32
  }
  func.func @transform_6(%arg0: i32) -> (i32, i32) {
    %c0_i32 = arith.constant 0 : i32
    %c0_i32_0 = arith.constant 0 : i32
    %c0_i32_1 = arith.constant 0 : i32
    return %c0_i32, %c0_i32_0 : i32, i32
  }
  func.func @transform_7(%arg0: i32) -> (i32, i32) {
    %c0_i32 = arith.constant 0 : i32
    %c0_i32_0 = arith.constant 0 : i32
    return %arg0, %c0_i32 : i32, i32
  }
}

module attributes {stable_mosaic.version = 11 : i64} {
  func.func @_mlp_kernel(%arg0: i32, %arg1: memref<8x128xf32, #tpu.memory_space<vmem>>, %arg2: memref<128x128xf32, #tpu.memory_space<vmem>>, %arg3: memref<1x128xf32, #tpu.memory_space<vmem>>, %arg4: memref<128x128xf32, #tpu.memory_space<vmem>>, %arg5: memref<1x128xf32, #tpu.memory_space<vmem>>, %arg6: memref<128x128xf32, #tpu.memory_space<vmem>>, %arg7: memref<1x128xf32, #tpu.memory_space<vmem>>, %arg8: memref<8x128xf32, #tpu.memory_space<vmem>>) attributes {dimension_semantics = [#tpu.dimension_semantics<parallel>], iteration_bounds = array<i64: 1>, scalar_prefetch = 0 : i64, scratch_operands = 0 : i64, tpu.core_type = #tpu.core_type<tc>, window_params = [{transform_indices = @transform_0, window_bounds = array<i64: 8, 128>}, {pipeline_mode = #tpu.pipeline_mode<synchronous>, transform_indices = @transform_1, window_bounds = array<i64: 128, 128>}, {pipeline_mode = #tpu.pipeline_mode<synchronous>, transform_indices = @transform_2, window_bounds = array<i64: 1, 128>}, {pipeline_mode = #tpu.pipeline_mode<synchronous>, transform_indices = @transform_3, window_bounds = array<i64: 128, 128>}, {pipeline_mode = #tpu.pipeline_mode<synchronous>, transform_indices = @transform_4, window_bounds = array<i64: 1, 128>}, {pipeline_mode = #tpu.pipeline_mode<synchronous>, transform_indices = @transform_5, window_bounds = array<i64: 128, 128>}, {pipeline_mode = #tpu.pipeline_mode<synchronous>, transform_indices = @transform_6, window_bounds = array<i64: 1, 128>}, {transform_indices = @transform_7, window_bounds = array<i64: 8, 128>}]} {
    %c0 = arith.constant 0 : index
    %c0_0 = arith.constant 0 : index
    %0 = vector.load %arg1[%c0, %c0_0] : memref<8x128xf32, #tpu.memory_space<vmem>>, vector<8x128xf32>
    %c0_1 = arith.constant 0 : index
    %c0_2 = arith.constant 0 : index
    %1 = vector.load %arg2[%c0_1, %c0_2] : memref<128x128xf32, #tpu.memory_space<vmem>>, vector<128x128xf32>
    %c0_3 = arith.constant 0 : index
    %c0_4 = arith.constant 0 : index
    %2 = vector.load %arg3[%c0_3, %c0_4] : memref<1x128xf32, #tpu.memory_space<vmem>>, vector<1x128xf32>
    %cst = arith.constant dense<0.000000e+00> : vector<8x128xf32>
    %3 = tpu.matmul %0, %1, %cst {dimension_numbers = #tpu.dot_dimension_numbers<[1], [0], [0], [1], [0, 0, 1, 1], [], []>} : vector<8x128xf32>, vector<128x128xf32>, vector<8x128xf32> -> vector<8x128xf32>
    %4 = vector.broadcast %2 : vector<1x128xf32> to vector<8x128xf32>
    %5 = arith.addf %3, %4 : vector<8x128xf32>
    %cst_5 = arith.constant 0.000000e+00 : f32
    %6 = vector.broadcast %cst_5 : f32 to vector<8x128xf32>
    %7 = arith.maximumf %5, %6 : vector<8x128xf32>
    %c0_6 = arith.constant 0 : index
    %c0_7 = arith.constant 0 : index
    %8 = vector.load %arg4[%c0_6, %c0_7] : memref<128x128xf32, #tpu.memory_space<vmem>>, vector<128x128xf32>
    %c0_8 = arith.constant 0 : index
    %c0_9 = arith.constant 0 : index
    %9 = vector.load %arg5[%c0_8, %c0_9] : memref<1x128xf32, #tpu.memory_space<vmem>>, vector<1x128xf32>
    %cst_10 = arith.constant dense<0.000000e+00> : vector<8x128xf32>
    %10 = tpu.matmul %7, %8, %cst_10 {dimension_numbers = #tpu.dot_dimension_numbers<[1], [0], [0], [1], [0, 0, 1, 1], [], []>} : vector<8x128xf32>, vector<128x128xf32>, vector<8x128xf32> -> vector<8x128xf32>
    %11 = vector.broadcast %9 : vector<1x128xf32> to vector<8x128xf32>
    %12 = arith.addf %10, %11 : vector<8x128xf32>
    %cst_11 = arith.constant 0.000000e+00 : f32
    %13 = vector.broadcast %cst_11 : f32 to vector<8x128xf32>
    %14 = arith.maximumf %12, %13 : vector<8x128xf32>
    %c0_12 = arith.constant 0 : index
    %c0_13 = arith.constant 0 : index
    %15 = vector.load %arg6[%c0_12, %c0_13] : memref<128x128xf32, #tpu.memory_space<vmem>>, vector<128x128xf32>
    %c0_14 = arith.constant 0 : index
    %c0_15 = arith.constant 0 : index
    %16 = vector.load %arg7[%c0_14, %c0_15] : memref<1x128xf32, #tpu.memory_space<vmem>>, vector<1x128xf32>
    %cst_16 = arith.constant dense<0.000000e+00> : vector<8x128xf32>
    %17 = tpu.matmul %14, %15, %cst_16 {dimension_numbers = #tpu.dot_dimension_numbers<[1], [0], [0], [1], [0, 0, 1, 1], [], []>} : vector<8x128xf32>, vector<128x128xf32>, vector<8x128xf32> -> vector<8x128xf32>
    %18 = vector.broadcast %16 : vector<1x128xf32> to vector<8x128xf32>
    %19 = arith.addf %17, %18 : vector<8x128xf32>
    %c0_17 = arith.constant 0 : index
    %c0_18 = arith.constant 0 : index
    %20 = vector.load %arg8[%c0_17, %c0_18] : memref<8x128xf32, #tpu.memory_space<vmem>>, vector<8x128xf32>
    tpu.vector_store %arg8[%c0_17, %c0_18], %19 {strides = array<i32>} : memref<8x128xf32, #tpu.memory_space<vmem>>, vector<8x128xf32>,
    return
  }
  func.func @transform_0(%arg0: i32) -> (i32, i32) {
    %c0_i32 = arith.constant 0 : i32
    %c0_i32_0 = arith.constant 0 : i32
    return %arg0, %c0_i32 : i32, i32
  }
  func.func @transform_1(%arg0: i32) -> (i32, i32) {
    %c0_i32 = arith.constant 0 : i32
    %c0_i32_0 = arith.constant 0 : i32
    %c0_i32_1 = arith.constant 0 : i32
    return %c0_i32, %c0_i32_0 : i32, i32
  }
  func.func @transform_2(%arg0: i32) -> (i32, i32) {
    %c0_i32 = arith.constant 0 : i32
    %c0_i32_0 = arith.constant 0 : i32
    %c0_i32_1 = arith.constant 0 : i32
    return %c0_i32, %c0_i32_0 : i32, i32
  }
  func.func @transform_3(%arg0: i32) -> (i32, i32) {
    %c0_i32 = arith.constant 0 : i32
    %c0_i32_0 = arith.constant 0 : i32
    %c0_i32_1 = arith.constant 0 : i32
    return %c0_i32, %c0_i32_0 : i32, i32
  }
  func.func @transform_4(%arg0: i32) -> (i32, i32) {
    %c0_i32 = arith.constant 0 : i32
    %c0_i32_0 = arith.constant 0 : i32
    %c0_i32_1 = arith.constant 0 : i32
    return %c0_i32, %c0_i32_0 : i32, i32
  }
  func.func @transform_5(%arg0: i32) -> (i32, i32) {
    %c0_i32 = arith.constant 0 : i32
    %c0_i32_0 = arith.constant 0 : i32
    %c0_i32_1 = arith.constant 0 : i32
    return %c0_i32, %c0_i32_0 : i32, i32
  }
  func.func @transform_6(%arg0: i32) -> (i32, i32) {
    %c0_i32 = arith.constant 0 : i32
    %c0_i32_0 = arith.constant 0 : i32
    %c0_i32_1 = arith.constant 0 : i32
    return %c0_i32, %c0_i32_0 : i32, i32
  }
  func.func @transform_7(%arg0: i32) -> (i32, i32) {
    %c0_i32 = arith.constant 0 : i32
    %c0_i32_0 = arith.constant 0 : i32
    return %arg0, %c0_i32 : i32, i32
  }
}

</mosaic_0001>

<bundles_post_ra>
// kernel: tpu_custom_call.1
= control target key start
LH: loop header
LB: loop body
LE: loop exit
PB: predicated region body
PF: predicated region fallthrough
CT: control target
= control target key end

     0   :  { %12 = vsyncpa [#allocation3], 0  ;;  %s440_s0 = inlined_call_operand.hbm [shape: f32[8,128], index: 0, kind: input, shape index: {}]   ;;  %s441_s1 = inlined_call_operand.hbm [shape: f32[128,128], index: 1, kind: input, shape index: {}]   ;;  %s442_s2 = inlined_call_operand.vmem [shape: f32[1,128], index: 2, kind: input, shape index: {}]   ;;  %s443_s3 = inlined_call_operand.hbm [shape: f32[128,128], index: 3, kind: input, shape index: {}]   ;;  %s444_s4 = inlined_call_operand.vmem [shape: f32[1,128], index: 4, kind: input, shape index: {}]   ;;  %s445_s5 = inlined_call_operand.hbm [shape: f32[128,128], index: 5, kind: input, shape index: {}]   ;;  %s446_s6 = inlined_call_operand.vmem [shape: f32[1,128], index: 6, kind: input, shape index: {}]   ;;  %s447_s7 = inlined_call_operand.hbm [shape: f32[8,128], index: 7, kind: output, shape index: {}]  }
   0x1   :  { %13 = vsyncpa [#allocation6], 0 }
   0x2   :  { %14 = vsyncpa [#allocation9], 0  ;;  %s31_s26 = sshll.u32 %s441_s1, 4  ;;  %s32_s26 = int_to_ptr.hbm [resolvable:$true] %s31_s26 }
   0x3   :  { %15 = vsyncpa [#allocation4], 0  ;;  %s369_s27 = smov [#allocation5]   ;;  %s21_s8 = sshll.u32 %s440_s0, 4  ;;  %s22_s8 = int_to_ptr.hbm [resolvable:$true] %s21_s8 }
   0x4   :  { %s33_s28 = sshll.u32 %s369_s27, 4  ;;  %s370_s9 = smov 128   ;;  %s34_s28 = int_to_ptr.vmem [resolvable:$true] %s33_s28 }
   0x5   :  { %s371_s10 = smov 8   ;;  %s372_s11 = smov [#allocation2]  }
   0x6   :  { %39 = dma.hbm_to_vmem [thread:$0]  %s32_s26, 2048, %s34_s28, [#allocation6], %s370_s9, %s370_s9, %s371_s10  }
   0x7   :  { %s23_s12 = sshll.u32 %s372_s11, 4  ;;  %s46_s15 = sshll.u32 %s443_s3, 4  ;;  %s24_s12 = int_to_ptr.vmem [resolvable:$true] %s23_s12  ;;  %s47_s15 = int_to_ptr.hbm [resolvable:$true] %s46_s15 }
   0x8   :  { %26 = dma.hbm_to_vmem [thread:$0]  %s22_s8, 128, %s24_s12, [#allocation3]  }
   0x9   :  { %s61_s17 = sshll.u32 %s445_s5, 4  ;;  %s373_s18 = smov [#allocation7]   ;;  %s62_s17 = int_to_ptr.hbm [resolvable:$true] %s61_s17 }
   0xa   :  { %s48_s19 = sshll.u32 %s373_s18, 4  ;;  %s374_s0 = smov [#allocation8]   ;;  %s49_s19 = int_to_ptr.vmem [resolvable:$true] %s48_s19 }
   0xb   :  { %54 = dma.hbm_to_vmem [thread:$0]  %s47_s15, 2048, %s49_s19, [#allocation6], %s370_s9, %s370_s9, %s371_s10  }
   0xc   :  { %s63_s20 = sshll.u32 %s374_s0, 4  ;;  %s64_s20 = int_to_ptr.vmem [resolvable:$true] %s63_s20 }
   0xd   :  { %69 = dma.hbm_to_vmem [thread:$0]  %s62_s17, 2048, %s64_s20, [#allocation9], %s370_s9, %s370_s9, %s371_s10  }
   0xe   :  { %361 = dma.done.wait [#allocation3], 128  }
   0xf   :  { %362 = vsyncadd [#allocation3], 4294967168 }
  0x10   :  { %363 = dma.done.wait [#allocation6], 4096  }
  0x11   :  { %364 = vsyncadd [#allocation6], 4294963200 }
  0x12   :  { %365 = dma.done.wait [#allocation9], 2048  }
  0x13   :  { %366 = vsyncadd [#allocation9], 4294965248  ;;  %v104_v0 = vld [vmem:[#allocation5 + $0x78] sm:$0xff]  ;;  %v103_v1 = vld [vmem:[#allocation5 + $0x70] sm:$0xff]  ;;  %s375_s24 = smov [#allocation10]   ;;  %s219_s28 = sshll.u32 %s447_s7, 4  ;;  %s220_s28 = int_to_ptr.hbm [resolvable:$true] %s219_s28 }
  0x14   :  { %109 = vmatpush.msra.mxu0 %v104_v0  ;;  %v102_v2 = vld [vmem:[#allocation5 + $0x68] sm:$0xff]  ;;  %v101_v3 = vld [vmem:[#allocation5 + $0x60] sm:$0xff]  ;;  %v145_v4 = vld [vmem:[#allocation7 + $0x78] sm:$0xff]  ;;  %s217_s25 = sshll.u32 %s375_s24, 4  ;;  %s218_s25 = int_to_ptr.vmem [resolvable:$true] %s217_s25 }
  0x15   :  { %v100_v5 = vld [vmem:[#allocation5 + $0x58] sm:$0xff]  ;;  %150 = vmatpush.msra.mxu1 %v145_v4  ;;  %v144_v6 = vld [vmem:[#allocation7 + $0x70] sm:$0xff]  ;;  %v143_v7 = vld [vmem:[#allocation7 + $0x68] sm:$0xff] }
  0x16   :  { %110 = vmatpush.msra.mxu0 %v103_v1  ;;  %v99_v8 = vld [vmem:[#allocation5 + $0x50] sm:$0xff]  ;;  %v142_v9 = vld [vmem:[#allocation7 + $0x60] sm:$0xff]  ;;  %v98_v10 = vld [vmem:[#allocation5 + $0x48] sm:$0xff] }
  0x17   :  { %151 = vmatpush.msra.mxu1 %v144_v6  ;;  %v141_v11 = vld [vmem:[#allocation7 + $0x58] sm:$0xff]  ;;  %v97_v12 = vld [vmem:[#allocation5 + $0x40] sm:$0xff]  ;;  %v140_v13 = vld [vmem:[#allocation7 + $0x50] sm:$0xff] }
  0x18   :  { %111 = vmatpush.msra.mxu0 %v102_v2  ;;  %v96_v14 = vld [vmem:[#allocation5 + $0x38] sm:$0xff]  ;;  %v139_v15 = vld [vmem:[#allocation7 + $0x48] sm:$0xff]  ;;  %v95_v16 = vld [vmem:[#allocation5 + $0x30] sm:$0xff] }
  0x19   :  { %152 = vmatpush.msra.mxu1 %v143_v7  ;;  %v138_v17 = vld [vmem:[#allocation7 + $0x40] sm:$0xff]  ;;  %v94_v18 = vld [vmem:[#allocation5 + $0x28] sm:$0xff]  ;;  %v137_v19 = vld [vmem:[#allocation7 + $0x38] sm:$0xff] }
  0x1a   :  { %112 = vmatpush.msra.mxu0 %v101_v3  ;;  %v93_v20 = vld [vmem:[#allocation5 + $0x20] sm:$0xff]  ;;  %v136_v21 = vld [vmem:[#allocation7 + $0x30] sm:$0xff]  ;;  %v92_v22 = vld [vmem:[#allocation5 + $0x18] sm:$0xff] }
  0x1b   :  { %153 = vmatpush.msra.mxu1 %v142_v9  ;;  %v135_v23 = vld [vmem:[#allocation7 + $0x28] sm:$0xff]  ;;  %v91_v24 = vld [vmem:[#allocation5 + $0x10] sm:$0xff]  ;;  %v134_v25 = vld [vmem:[#allocation7 + $0x20] sm:$0xff] }
  0x1c   :  { %113 = vmatpush.msra.mxu0 %v100_v5  ;;  %v90_v26 = vld [vmem:[#allocation5 + $0x8] sm:$0xff]  ;;  %v133_v27 = vld [vmem:[#allocation7 + $0x18] sm:$0xff]  ;;  %v89_v28 = vld [vmem:[#allocation5] sm:$0xff] }
  0x1d   :  { %154 = vmatpush.msra.mxu1 %v141_v11  ;;  %v88_v29 = vld [vmem:[#allocation2] sm:$0xff]  ;;  %v132_v30 = vld [vmem:[#allocation7 + $0x10] sm:$0xff]  ;;  %v131_v31 = vld [vmem:[#allocation7 + $0x8] sm:$0xff] }
  0x1e   :  { %114 = vmatpush.msra.mxu0 %v99_v8  ;;  %v130_v32 = vld [vmem:[#allocation7] sm:$0xff]  ;;  %v186_v33 = vld [vmem:[#allocation8 + $0x78] sm:$0xff]  ;;  %v185_v34 = vld [vmem:[#allocation8 + $0x70] sm:$0xff] }
  0x1f   :  { %155 = vmatpush.msra.mxu1 %v140_v13  ;;  %191 = vmatpush.msra.mxu2 %v186_v33  ;;  %v184_v35 = vld [vmem:[#allocation8 + $0x68] sm:$0xff]  ;;  %v183_v36 = vld [vmem:[#allocation8 + $0x60] sm:$0xff]  ;;  %v182_v37 = vld [vmem:[#allocation8 + $0x58] sm:$0xff] }
  0x20   :  { %115 = vmatpush.msra.mxu0 %v98_v10  ;;  %v181_v38 = vld [vmem:[#allocation8 + $0x50] sm:$0xff]  ;;  %v180_v39 = vld [vmem:[#allocation8 + $0x48] sm:$0xff]  ;;  %v179_v40 = vld [vmem:[#allocation8 + $0x40] sm:$0xff] }
  0x21   :  { %156 = vmatpush.msra.mxu1 %v139_v15  ;;  %192 = vmatpush.msra.mxu2 %v185_v34  ;;  %v178_v41 = vld [vmem:[#allocation8 + $0x38] sm:$0xff]  ;;  %v177_v42 = vld [vmem:[#allocation8 + $0x30] sm:$0xff]  ;;  %v176_v43 = vld [vmem:[#allocation8 + $0x28] sm:$0xff] }
  0x22   :  { %116 = vmatpush.msra.mxu0 %v97_v12  ;;  %v175_v44 = vld [vmem:[#allocation8 + $0x20] sm:$0xff]  ;;  %v174_v45 = vld [vmem:[#allocation8 + $0x18] sm:$0xff]  ;;  %v173_v50 = vld [vmem:[#allocation8 + $0x10] sm:$0xff] }
  0x23   :  { %157 = vmatpush.msra.mxu1 %v138_v17  ;;  %193 = vmatpush.msra.mxu2 %v184_v35  ;;  %v238_v46 = vld [vmem:[%s442_s2] ss:$0 sm:$0xff]  ;;  %v172_v51 = vld [vmem:[#allocation8 + $0x8] sm:$0xff]  ;;  %v171_v52 = vld [vmem:[#allocation8] sm:$0xff] }
  0x24   :  { %117 = vmatpush.msra.mxu0 %v96_v14  ;;  %v239_v53 = vld [vmem:[%s444_s4] ss:$0 sm:$0xff] }
  0x25   :  { %158 = vmatpush.msra.mxu1 %v137_v19  ;;  %194 = vmatpush.msra.mxu2 %v183_v36  ;;  %v240_v57 = vld [vmem:[%s446_s6] ss:$0 sm:$0xff] }
  0x26   :  { %118 = vmatpush.msra.mxu0 %v95_v16 }
  0x27   :  { %159 = vmatpush.msra.mxu1 %v136_v21  ;;  %195 = vmatpush.msra.mxu2 %v182_v37 }
  0x28   :  { %119 = vmatpush.msra.mxu0 %v94_v18 }
  0x29   :  { %160 = vmatpush.msra.mxu1 %v135_v23  ;;  %196 = vmatpush.msra.mxu2 %v181_v38 }
  0x2a   :  { %120 = vmatpush.msra.mxu0 %v93_v20 }
  0x2b   :  { %161 = vmatpush.msra.mxu1 %v134_v25  ;;  %197 = vmatpush.msra.mxu2 %v180_v39 }
  0x2c   :  { %121 = vmatpush.msra.mxu0 %v92_v22 }
  0x2d   :  { %162 = vmatpush.msra.mxu1 %v133_v27  ;;  %198 = vmatpush.msra.mxu2 %v179_v40 }
  0x2e   :  { %122 = vmatpush.msra.mxu0 %v91_v24 }
  0x2f   :  { %163 = vmatpush.msra.mxu1 %v132_v30  ;;  %199 = vmatpush.msra.mxu2 %v178_v41 }
  0x30   :  { %123 = vmatpush.msra.mxu0 %v90_v26 }
  0x31   :  { %164 = vmatpush.msra.mxu1 %v131_v31  ;;  %200 = vmatpush.msra.mxu2 %v177_v42 }
  0x32   :  { %124 = vmatpush.msra.mxu0 %v89_v28 }
  0x33   :  { %125 = vmatmul.f32.vlgmr.msra.gmra.mxu0 %v88_v29  ;;  %165 = vmatpush.msra.mxu1 %v130_v32 }
  0x34   :  { %201 = vmatpush.msra.mxu2 %v176_v43 }
  0x36   :  { %202 = vmatpush.msra.mxu2 %v175_v44 }
  0x38   :  { %203 = vmatpush.msra.mxu2 %v174_v45 }
  0x3a   :  { %204 = vmatpush.msra.mxu2 %v173_v50 }
  0x3c   :  { %205 = vmatpush.msra.mxu2 %v172_v51 }
  0x3e   :  { %206 = vmatpush.msra.mxu2 %v171_v52 }
  0xb0   :  { %v126_v47 = vpop.f32.mrf.mxu0 }
  0xb1   :  { %v127_v48 = vadd.f32 %v238_v46, %v126_v47 }
  0xb3   :  { %v129_v49 = vmax.f32 %v127_v48, 0.0 }
  0xb5   :  { %166 = vmatmul.f32.vlgmr.msra.gmra.mxu1 %v129_v49 }
 0x132   :  { %v167_v54 = vpop.f32.mrf.mxu1 }
 0x133   :  { %v168_v55 = vadd.f32 %v239_v53, %v167_v54 }
 0x135   :  { %v170_v56 = vmax.f32 %v168_v55, 0.0 }
 0x137   :  { %207 = vmatmul.f32.vlgmr.msra.gmra.mxu2 %v170_v56 }
 0x1ba   :  { %v208_v58 = vpop.f32.mrf.mxu2 }
 0x1bb   :  { %v209_v59 = vadd.f32 %v240_v57, %v208_v58 }
 0x1bd   :  { %211 = vst [vmem:[#allocation10] sm:$0xff] %v209_v59 }
 0x1be   :  { %222 = dma.vmem_to_hbm [thread:$0]  %s218_s25, 128, %s220_s28, [#allocation4]  }
 0x1bf   :  { %367 = dma.done.wait [#allocation4], 128  }
 0x1c0   :  { %368 = vsyncadd [#allocation4], 4294967168 }
 0x1c1   :  { %227 = vsyncpa [#allocation3], 1 }
 0x1c2   :  { %228 = vsyncpa [#allocation6], 1 }
 0x1c3   :  { %229 = vsyncpa [#allocation9], 1 }
 0x1c4   :  { %230 = vsyncpa [#allocation4], 1 }

// kernel: tpu_custom_call.1
= control target key start
LH: loop header
LB: loop body
LE: loop exit
PB: predicated region body
PF: predicated region fallthrough
CT: control target
= control target key end

     0   :  { %12 = vsyncpa [#allocation3], 0  ;;  %s440_s0 = inlined_call_operand.hbm [shape: f32[8,128], index: 0, kind: input, shape index: {}]   ;;  %s441_s1 = inlined_call_operand.hbm [shape: f32[128,128], index: 1, kind: input, shape index: {}]   ;;  %s442_s2 = inlined_call_operand.vmem [shape: f32[1,128], index: 2, kind: input, shape index: {}]   ;;  %s443_s3 = inlined_call_operand.hbm [shape: f32[128,128], index: 3, kind: input, shape index: {}]   ;;  %s444_s4 = inlined_call_operand.vmem [shape: f32[1,128], index: 4, kind: input, shape index: {}]   ;;  %s445_s5 = inlined_call_operand.hbm [shape: f32[128,128], index: 5, kind: input, shape index: {}]   ;;  %s446_s6 = inlined_call_operand.vmem [shape: f32[1,128], index: 6, kind: input, shape index: {}]   ;;  %s447_s7 = inlined_call_operand.hbm [shape: f32[8,128], index: 7, kind: output, shape index: {}]  }
   0x1   :  { %13 = vsyncpa [#allocation6], 0 }
   0x2   :  { %14 = vsyncpa [#allocation9], 0  ;;  %s31_s26 = sshll.u32 %s441_s1, 4  ;;  %s32_s26 = int_to_ptr.hbm [resolvable:$true] %s31_s26 }
   0x3   :  { %15 = vsyncpa [#allocation4], 0  ;;  %s369_s27 = smov [#allocation5]   ;;  %s21_s8 = sshll.u32 %s440_s0, 4  ;;  %s22_s8 = int_to_ptr.hbm [resolvable:$true] %s21_s8 }
   0x4   :  { %s33_s28 = sshll.u32 %s369_s27, 4  ;;  %s370_s9 = smov 128   ;;  %s34_s28 = int_to_ptr.vmem [resolvable:$true] %s33_s28 }
   0x5   :  { %s371_s10 = smov 8   ;;  %s372_s11 = smov [#allocation2]  }
   0x6   :  { %39 = dma.hbm_to_vmem [thread:$0]  %s32_s26, 2048, %s34_s28, [#allocation6], %s370_s9, %s370_s9, %s371_s10  }
   0x7   :  { %s23_s12 = sshll.u32 %s372_s11, 4  ;;  %s46_s15 = sshll.u32 %s443_s3, 4  ;;  %s24_s12 = int_to_ptr.vmem [resolvable:$true] %s23_s12  ;;  %s47_s15 = int_to_ptr.hbm [resolvable:$true] %s46_s15 }
   0x8   :  { %26 = dma.hbm_to_vmem [thread:$0]  %s22_s8, 128, %s24_s12, [#allocation3]  }
   0x9   :  { %s61_s17 = sshll.u32 %s445_s5, 4  ;;  %s373_s18 = smov [#allocation7]   ;;  %s62_s17 = int_to_ptr.hbm [resolvable:$true] %s61_s17 }
   0xa   :  { %s48_s19 = sshll.u32 %s373_s18, 4  ;;  %s374_s0 = smov [#allocation8]   ;;  %s49_s19 = int_to_ptr.vmem [resolvable:$true] %s48_s19 }
   0xb   :  { %54 = dma.hbm_to_vmem [thread:$0]  %s47_s15, 2048, %s49_s19, [#allocation6], %s370_s9, %s370_s9, %s371_s10  }
   0xc   :  { %s63_s20 = sshll.u32 %s374_s0, 4  ;;  %s64_s20 = int_to_ptr.vmem [resolvable:$true] %s63_s20 }
   0xd   :  { %69 = dma.hbm_to_vmem [thread:$0]  %s62_s17, 2048, %s64_s20, [#allocation9], %s370_s9, %s370_s9, %s371_s10  }
   0xe   :  { %361 = dma.done.wait [#allocation3], 128  }
   0xf   :  { %362 = vsyncadd [#allocation3], 4294967168 }
  0x10   :  { %363 = dma.done.wait [#allocation6], 4096  }
  0x11   :  { %364 = vsyncadd [#allocation6], 4294963200 }
  0x12   :  { %365 = dma.done.wait [#allocation9], 2048  }
  0x13   :  { %366 = vsyncadd [#allocation9], 4294965248  ;;  %v104_v0 = vld [vmem:[#allocation5 + $0x78] sm:$0xff]  ;;  %v103_v1 = vld [vmem:[#allocation5 + $0x70] sm:$0xff]  ;;  %s375_s24 = smov [#allocation10]   ;;  %s219_s28 = sshll.u32 %s447_s7, 4  ;;  %s220_s28 = int_to_ptr.hbm [resolvable:$true] %s219_s28 }
  0x14   :  { %109 = vmatpush.msra.mxu0 %v104_v0  ;;  %v102_v2 = vld [vmem:[#allocation5 + $0x68] sm:$0xff]  ;;  %v101_v3 = vld [vmem:[#allocation5 + $0x60] sm:$0xff]  ;;  %v145_v4 = vld [vmem:[#allocation7 + $0x78] sm:$0xff]  ;;  %s217_s25 = sshll.u32 %s375_s24, 4  ;;  %s218_s25 = int_to_ptr.vmem [resolvable:$true] %s217_s25 }
  0x15   :  { %v100_v5 = vld [vmem:[#allocation5 + $0x58] sm:$0xff]  ;;  %150 = vmatpush.msra.mxu1 %v145_v4  ;;  %v144_v6 = vld [vmem:[#allocation7 + $0x70] sm:$0xff]  ;;  %v143_v7 = vld [vmem:[#allocation7 + $0x68] sm:$0xff] }
  0x16   :  { %110 = vmatpush.msra.mxu0 %v103_v1  ;;  %v99_v8 = vld [vmem:[#allocation5 + $0x50] sm:$0xff]  ;;  %v142_v9 = vld [vmem:[#allocation7 + $0x60] sm:$0xff]  ;;  %v98_v10 = vld [vmem:[#allocation5 + $0x48] sm:$0xff] }
  0x17   :  { %151 = vmatpush.msra.mxu1 %v144_v6  ;;  %v141_v11 = vld [vmem:[#allocation7 + $0x58] sm:$0xff]  ;;  %v97_v12 = vld [vmem:[#allocation5 + $0x40] sm:$0xff]  ;;  %v140_v13 = vld [vmem:[#allocation7 + $0x50] sm:$0xff] }
  0x18   :  { %111 = vmatpush.msra.mxu0 %v102_v2  ;;  %v96_v14 = vld [vmem:[#allocation5 + $0x38] sm:$0xff]  ;;  %v139_v15 = vld [vmem:[#allocation7 + $0x48] sm:$0xff]  ;;  %v95_v16 = vld [vmem:[#allocation5 + $0x30] sm:$0xff] }
  0x19   :  { %152 = vmatpush.msra.mxu1 %v143_v7  ;;  %v138_v17 = vld [vmem:[#allocation7 + $0x40] sm:$0xff]  ;;  %v94_v18 = vld [vmem:[#allocation5 + $0x28] sm:$0xff]  ;;  %v137_v19 = vld [vmem:[#allocation7 + $0x38] sm:$0xff] }
  0x1a   :  { %112 = vmatpush.msra.mxu0 %v101_v3  ;;  %v93_v20 = vld [vmem:[#allocation5 + $0x20] sm:$0xff]  ;;  %v136_v21 = vld [vmem:[#allocation7 + $0x30] sm:$0xff]  ;;  %v92_v22 = vld [vmem:[#allocation5 + $0x18] sm:$0xff] }
  0x1b   :  { %153 = vmatpush.msra.mxu1 %v142_v9  ;;  %v135_v23 = vld [vmem:[#allocation7 + $0x28] sm:$0xff]  ;;  %v91_v24 = vld [vmem:[#allocation5 + $0x10] sm:$0xff]  ;;  %v134_v25 = vld [vmem:[#allocation7 + $0x20] sm:$0xff] }
  0x1c   :  { %113 = vmatpush.msra.mxu0 %v100_v5  ;;  %v90_v26 = vld [vmem:[#allocation5 + $0x8] sm:$0xff]  ;;  %v133_v27 = vld [vmem:[#allocation7 + $0x18] sm:$0xff]  ;;  %v89_v28 = vld [vmem:[#allocation5] sm:$0xff] }
  0x1d   :  { %154 = vmatpush.msra.mxu1 %v141_v11  ;;  %v88_v29 = vld [vmem:[#allocation2] sm:$0xff]  ;;  %v132_v30 = vld [vmem:[#allocation7 + $0x10] sm:$0xff]  ;;  %v131_v31 = vld [vmem:[#allocation7 + $0x8] sm:$0xff] }
  0x1e   :  { %114 = vmatpush.msra.mxu0 %v99_v8  ;;  %v130_v32 = vld [vmem:[#allocation7] sm:$0xff]  ;;  %v186_v33 = vld [vmem:[#allocation8 + $0x78] sm:$0xff]  ;;  %v185_v34 = vld [vmem:[#allocation8 + $0x70] sm:$0xff] }
  0x1f   :  { %155 = vmatpush.msra.mxu1 %v140_v13  ;;  %191 = vmatpush.msra.mxu2 %v186_v33  ;;  %v184_v35 = vld [vmem:[#allocation8 + $0x68] sm:$0xff]  ;;  %v183_v36 = vld [vmem:[#allocation8 + $0x60] sm:$0xff]  ;;  %v182_v37 = vld [vmem:[#allocation8 + $0x58] sm:$0xff] }
  0x20   :  { %115 = vmatpush.msra.mxu0 %v98_v10  ;;  %v181_v38 = vld [vmem:[#allocation8 + $0x50] sm:$0xff]  ;;  %v180_v39 = vld [vmem:[#allocation8 + $0x48] sm:$0xff]  ;;  %v179_v40 = vld [vmem:[#allocation8 + $0x40] sm:$0xff] }
  0x21   :  { %156 = vmatpush.msra.mxu1 %v139_v15  ;;  %192 = vmatpush.msra.mxu2 %v185_v34  ;;  %v178_v41 = vld [vmem:[#allocation8 + $0x38] sm:$0xff]  ;;  %v177_v42 = vld [vmem:[#allocation8 + $0x30] sm:$0xff]  ;;  %v176_v43 = vld [vmem:[#allocation8 + $0x28] sm:$0xff] }
  0x22   :  { %116 = vmatpush.msra.mxu0 %v97_v12  ;;  %v175_v44 = vld [vmem:[#allocation8 + $0x20] sm:$0xff]  ;;  %v174_v45 = vld [vmem:[#allocation8 + $0x18] sm:$0xff]  ;;  %v173_v50 = vld [vmem:[#allocation8 + $0x10] sm:$0xff] }
  0x23   :  { %157 = vmatpush.msra.mxu1 %v138_v17  ;;  %193 = vmatpush.msra.mxu2 %v184_v35  ;;  %v238_v46 = vld [vmem:[%s442_s2] ss:$0 sm:$0xff]  ;;  %v172_v51 = vld [vmem:[#allocation8 + $0x8] sm:$0xff]  ;;  %v171_v52 = vld [vmem:[#allocation8] sm:$0xff] }
  0x24   :  { %117 = vmatpush.msra.mxu0 %v96_v14  ;;  %v239_v53 = vld [vmem:[%s444_s4] ss:$0 sm:$0xff] }
  0x25   :  { %158 = vmatpush.msra.mxu1 %v137_v19  ;;  %194 = vmatpush.msra.mxu2 %v183_v36  ;;  %v240_v57 = vld [vmem:[%s446_s6] ss:$0 sm:$0xff] }
  0x26   :  { %118 = vmatpush.msra.mxu0 %v95_v16 }
  0x27   :  { %159 = vmatpush.msra.mxu1 %v136_v21  ;;  %195 = vmatpush.msra.mxu2 %v182_v37 }
  0x28   :  { %119 = vmatpush.msra.mxu0 %v94_v18 }
  0x29   :  { %160 = vmatpush.msra.mxu1 %v135_v23  ;;  %196 = vmatpush.msra.mxu2 %v181_v38 }
  0x2a   :  { %120 = vmatpush.msra.mxu0 %v93_v20 }
  0x2b   :  { %161 = vmatpush.msra.mxu1 %v134_v25  ;;  %197 = vmatpush.msra.mxu2 %v180_v39 }
  0x2c   :  { %121 = vmatpush.msra.mxu0 %v92_v22 }
  0x2d   :  { %162 = vmatpush.msra.mxu1 %v133_v27  ;;  %198 = vmatpush.msra.mxu2 %v179_v40 }
  0x2e   :  { %122 = vmatpush.msra.mxu0 %v91_v24 }
  0x2f   :  { %163 = vmatpush.msra.mxu1 %v132_v30  ;;  %199 = vmatpush.msra.mxu2 %v178_v41 }
  0x30   :  { %123 = vmatpush.msra.mxu0 %v90_v26 }
  0x31   :  { %164 = vmatpush.msra.mxu1 %v131_v31  ;;  %200 = vmatpush.msra.mxu2 %v177_v42 }
  0x32   :  { %124 = vmatpush.msra.mxu0 %v89_v28 }
  0x33   :  { %125 = vmatmul.f32.vlgmr.msra.gmra.mxu0 %v88_v29  ;;  %165 = vmatpush.msra.mxu1 %v130_v32 }
  0x34   :  { %201 = vmatpush.msra.mxu2 %v176_v43 }
  0x36   :  { %202 = vmatpush.msra.mxu2 %v175_v44 }
  0x38   :  { %203 = vmatpush.msra.mxu2 %v174_v45 }
  0x3a   :  { %204 = vmatpush.msra.mxu2 %v173_v50 }
  0x3c   :  { %205 = vmatpush.msra.mxu2 %v172_v51 }
  0x3e   :  { %206 = vmatpush.msra.mxu2 %v171_v52 }
  0xb0   :  { %v126_v47 = vpop.f32.mrf.mxu0 }
  0xb1   :  { %v127_v48 = vadd.f32 %v238_v46, %v126_v47 }
  0xb3   :  { %v129_v49 = vmax.f32 %v127_v48, 0.0 }
  0xb5   :  { %166 = vmatmul.f32.vlgmr.msra.gmra.mxu1 %v129_v49 }
 0x132   :  { %v167_v54 = vpop.f32.mrf.mxu1 }
 0x133   :  { %v168_v55 = vadd.f32 %v239_v53, %v167_v54 }
 0x135   :  { %v170_v56 = vmax.f32 %v168_v55, 0.0 }
 0x137   :  { %207 = vmatmul.f32.vlgmr.msra.gmra.mxu2 %v170_v56 }
 0x1ba   :  { %v208_v58 = vpop.f32.mrf.mxu2 }
 0x1bb   :  { %v209_v59 = vadd.f32 %v240_v57, %v208_v58 }
 0x1bd   :  { %211 = vst [vmem:[#allocation10] sm:$0xff] %v209_v59 }
 0x1be   :  { %222 = dma.vmem_to_hbm [thread:$0]  %s218_s25, 128, %s220_s28, [#allocation4]  }
 0x1bf   :  { %367 = dma.done.wait [#allocation4], 128  }
 0x1c0   :  { %368 = vsyncadd [#allocation4], 4294967168 }
 0x1c1   :  { %227 = vsyncpa [#allocation3], 1 }
 0x1c2   :  { %228 = vsyncpa [#allocation6], 1 }
 0x1c3   :  { %229 = vsyncpa [#allocation9], 1 }
 0x1c4   :  { %230 = vsyncpa [#allocation4], 1 }

</bundles_post_ra>
